<compile_context>
chip_gen: v7x
topology: tpu7x:2x2x1
jax: 0.10.0
libtpu: 0.0.40
codegen_flags: <defaults>
</compile_context>

<pallas_src>
import math

import numpy as np
import jax
import jax.numpy as jnp
from jax.experimental import pallas as pl
from jax.experimental.pallas import tpu as pltpu

# ----------------------------- sizes (scaled down) ----------------------------
B = 2                        # real batch
B_PAD = 8                    # batch padded to one sublane tile (image/fusion path)
C_IMG = 4                    # image channels
HW = 16                      # spatial (H = W = 16)
IMG_FLAT = C_IMG * HW * HW   # 1024
FEAT = 64                    # stand-in for ResNet50's 2048-d backbone feature
D = 32                       # stand-in for 768 (BERT hidden / image fc output)
S = 8                        # sequence length
BS = B * S                   # 16 flattened real (batch, seq) tokens
VOCAB = 100                  # tiny vocab (ids drawn from [0, 100))
VOCAB_PAD = 128              # embedding table zero-padded to one lane tile
FFN = 64                     # stand-in for BERT intermediate (3072)
FUSE_HID = 32                # stand-in for fusion hidden (256); == D for packing
OUT_LANES = 128              # lane-dense output slab width

assert FFN == FEAT and FUSE_HID == D and BS % 8 == 0

F32 = jnp.float32
BF16 = jnp.bfloat16
_VMEM = pl.BlockSpec(memory_space=pltpu.MemorySpace.VMEM)

# ---- row offsets inside the packed bf16 parameter slabs (all multiples of 16) ----
R_EMB = 0                       # word embeddings           (VOCAB_PAD, D)
R_POS = R_EMB + VOCAB_PAD       # position embeddings       (BS, D)
R_WQ = R_POS + BS               # (D, D)
R_WK = R_WQ + D
R_WV = R_WK + D
R_WO = R_WV + D
R_WP = R_WO + D                 # pooler weight
R_WFC = R_WP + D                # image fc weight           (FEAT, D)
R_W2 = R_WFC + FEAT             # FFN down-proj             (FFN, D)
R_FW1 = R_W2 + FFN              # fusion Linear1            (2D, FUSE_HID)
R_VEC32 = R_FW1 + 2 * D         # 16 packed vector rows     (16, D)
W32_ROWS = R_VEC32 + 16         # 512

R_WBB = 0                       # backbone weight           (C_IMG, FEAT) in rows 0..3
R_W1 = 16                       # FFN up-proj               (D, FFN)
R_VEC64 = R_W1 + D              # 16 packed vector rows     (16, FEAT)
W64_ROWS = R_VEC64 + 16         # 64

# static block-diagonal (per-example) attention structure, baked at trace time
_SAME_NP = ((np.arange(BS)[:, None] // S) == (np.arange(BS)[None, :] // S)
            ).astype(np.float32)


# --------------------------------- helpers ------------------------------------
def _layernorm(x, g, b, eps=1e-12):
    mu = jnp.mean(x, axis=-1, keepdims=True)
    var = jnp.mean((x - mu) * (x - mu), axis=-1, keepdims=True)
    return (x - mu) * jax.lax.rsqrt(var + eps) * g + b


def _l2_normalize(x, eps=1e-12):
    # F.normalize(x, p=2, dim=1): x / max(||x||, eps)
    ss = jnp.sum(x * x, axis=-1, keepdims=True)
    return x * jax.lax.rsqrt(jnp.maximum(ss, eps * eps))


# ------------------------------ fused kernel -----------------------------------
def fused_kernel(ids_ref, bias_ref, img_ref, w32_ref, w64_ref, out_ref):
    # ---- unpack small vector parameters (one aligned load per slab) ----
    vec32 = w32_ref[R_VEC32:R_VEC32 + 16, :].astype(F32)       # (16, D)
    vec64 = w64_ref[R_VEC64:R_VEC64 + 16, :].astype(F32)       # (16, FEAT)
    bq, bk, bv = vec32[0:1], vec32[1:2], vec32[2:3]
    bo, bp, b_fc, b2 = vec32[3:4], vec32[4:5], vec32[5:6], vec32[6:7]
    ln0g, ln0b = vec32[7:8], vec32[8:9]
    ln1g, ln1b = vec32[9:10], vec32[10:11]
    ln2g, ln2b = vec32[11:12], vec32[12:13]
    fb1, fw2r, fb2 = vec32[13:14], vec32[14:15], vec32[15:16, 0:1]
    b_bb, b1 = vec64[0:1], vec64[1:2]
    wbb = w64_ref[R_WBB:R_WBB + 16, :].astype(F32)              # rows 0..3 real

    # ---------------------------- image path ----------------------------------
    # TODO(synk): frozen ResNet50 trunk is not replicated; stand-in is global
    # average pool + one dense layer + ReLU, done as 4 lane-aligned reductions
    # and 4 broadcast FMAs (no big folded weight, no HBM bloat).
    x_im = img_ref[...].astype(F32)                             # (B_PAD, IMG_FLAT)
    feat = b_bb
    for c in range(C_IMG):
        pc = jnp.sum(x_im[:, c * HW * HW:(c + 1) * HW * HW],
                     axis=-1, keepdims=True) * (1.0 / (HW * HW))  # (B_PAD, 1)
        feat = feat + pc * wbb[c:c + 1, :]
    feat = jnp.maximum(feat, 0.0)                               # (B_PAD, FEAT)
    # image_encoder.fc: Linear(2048->768) -> ReLU -> Dropout(0.2) [identity @ eval]
    x_img = jnp.maximum(
        jnp.dot(feat.astype(BF16), w32_ref[R_WFC:R_WFC + FEAT, :],
                preferred_element_type=F32) + b_fc, 0.0)
    img_feat = _l2_normalize(x_img)                             # (B_PAD, D) f32

    # ---------------------------- text path ------------------------------------
    # Embedding lookup as a one-hot matmul (exact gather, stays on the MXU).
    ids = ids_ref[...]                                          # (BS, 1) int32
    vocab_iota = jax.lax.broadcasted_iota(jnp.int32, (BS, VOCAB_PAD), 1)
    onehot = (ids == vocab_iota).astype(BF16)                   # (BS, VOCAB_PAD)
    x = (jnp.dot(onehot, w32_ref[R_EMB:R_EMB + VOCAB_PAD, :],
                 preferred_element_type=F32)
         + w32_ref[R_POS:R_POS + BS, :].astype(F32))
    x = _layernorm(x, ln0g, ln0b)                               # (BS, D) f32

    # --- one BERT-style self-attention block (single head, head_dim = D) ---
    x_bf = x.astype(BF16)
    q = jnp.dot(x_bf, w32_ref[R_WQ:R_WQ + D, :], preferred_element_type=F32) + bq
    k = jnp.dot(x_bf, w32_ref[R_WK:R_WK + D, :], preferred_element_type=F32) + bk
    v = jnp.dot(x_bf, w32_ref[R_WV:R_WV + D, :], preferred_element_type=F32) + bv

    scores = jax.lax.dot_general(
        q.astype(BF16), k.astype(BF16), (((1,), (1,)), ((), ())),
        preferred_element_type=F32) * (1.0 / math.sqrt(D))      # (BS, BS)
    scores = scores + bias_ref[...]                             # additive mask (f32)

    m = jnp.max(scores, axis=-1, keepdims=True)
    e = jnp.exp(scores - m)
    attn = e * pl.reciprocal(jnp.sum(e, axis=-1, keepdims=True), approx=True)
    ctx = jnp.dot(attn.astype(BF16), v.astype(BF16),
                  preferred_element_type=F32)                   # (BS, D)

    attn_out = jnp.dot(ctx.astype(BF16), w32_ref[R_WO:R_WO + D, :],
                       preferred_element_type=F32) + bo
    h = _layernorm(x + attn_out, ln1g, ln1b)

    # --- feed-forward block ---
    ff = jnp.dot(h.astype(BF16), w64_ref[R_W1:R_W1 + D, :],
                 preferred_element_type=F32) + b1
    # TODO(synk): HF BERT uses exact erf GELU; tanh approximation used here.
    ff = jax.nn.gelu(ff, approximate=True)
    ff = jnp.dot(ff.astype(BF16), w32_ref[R_W2:R_W2 + FFN, :],
                 preferred_element_type=F32) + b2
    last_hidden = _layernorm(h + ff, ln2g, ln2b)                # (BS, D) f32

    # CLS extraction (rows 0, S) expanded to B_PAD rows via a tiny exact f32
    # selection matmul (padded rows select nothing -> zero, discarded later).
    sr = jax.lax.broadcasted_iota(jnp.int32, (B_PAD, BS), 0)
    sc = jax.lax.broadcasted_iota(jnp.int32, (B_PAD, BS), 1)
    sel = (sc == sr * S).astype(F32)                            # (B_PAD, BS)
    cls = jnp.dot(sel, last_hidden, preferred_element_type=F32)  # (B_PAD, D)

    pooler = jnp.tanh(jnp.dot(cls.astype(BF16), w32_ref[R_WP:R_WP + D, :],
                              preferred_element_type=F32) + bp)
    txt_feat = _l2_normalize((cls + pooler) * 0.5)              # (B_PAD, D)

    # ---------------------------- fusion head ----------------------------------
    # combined = cat([image_features, text_features], dim=1); Linear split so
    # cat @ W1 == img @ W1[:D] + txt @ W1[D:].
    fh = jnp.maximum(
        jnp.dot(img_feat.astype(BF16), w32_ref[R_FW1:R_FW1 + D, :],
                preferred_element_type=F32)
        + jnp.dot(txt_feat.astype(BF16), w32_ref[R_FW1 + D:R_FW1 + 2 * D, :],
                  preferred_element_type=F32)
        + fb1, 0.0)                                             # (B_PAD, FUSE_HID)
    # final Linear(FUSE_HID -> 1) as a lane reduction; broadcast into a
    # lane-dense (8,128) output slab (only column 0 is the real logit).
    logit = jnp.sum(fh * fw2r, axis=-1, keepdims=True) + fb2    # (B_PAD, 1)
    out_ref[...] = jnp.broadcast_to(logit, (B_PAD, OUT_LANES))


# ------------------------------- parameter init --------------------------------
def _xavier(key, shape):
    fan_in, fan_out = shape
    limit = math.sqrt(6.0 / (fan_in + fan_out))
    return jax.random.uniform(key, shape, F32, -limit, limit)


def init_params(key):
    ks = jax.random.split(key, 16)
    # ---- raw parameters, mirroring the module structure ----
    w_bb = _xavier(ks[0], (C_IMG, FEAT));  b_bb = jnp.zeros((FEAT,), F32)
    w_fc = _xavier(ks[1], (FEAT, D));      b_fc = jnp.zeros((D,), F32)
    word_emb = 0.02 * jax.random.normal(ks[2], (VOCAB, D), F32)
    pos_emb = 0.02 * jax.random.normal(ks[3], (S, D), F32)
    ln0g = jnp.ones((D,), F32); ln0b = jnp.zeros((D,), F32)
    wq = _xavier(ks[4], (D, D)); wk = _xavier(ks[5], (D, D)); wv = _xavier(ks[6], (D, D))
    bq = jnp.zeros((D,), F32); bk = jnp.zeros((D,), F32); bv = jnp.zeros((D,), F32)
    wo = _xavier(ks[7], (D, D)); bo = jnp.zeros((D,), F32)
    ln1g = jnp.ones((D,), F32); ln1b = jnp.zeros((D,), F32)
    w1 = _xavier(ks[8], (D, FFN)); b1 = jnp.zeros((FFN,), F32)
    w2 = _xavier(ks[9], (FFN, D)); b2 = jnp.zeros((D,), F32)
    ln2g = jnp.ones((D,), F32); ln2b = jnp.zeros((D,), F32)
    wp = _xavier(ks[10], (D, D)); bp = jnp.zeros((D,), F32)
    fw1 = _xavier(ks[11], (2 * D, FUSE_HID)); fb1 = jnp.zeros((FUSE_HID,), F32)
    fw2 = _xavier(ks[12], (FUSE_HID, 1));     fb2 = jnp.zeros((), F32)

    # ---- packed, kernel-friendly bf16 slabs (16-row-aligned sub-blocks) ----
    vec32 = jnp.stack([bq, bk, bv, bo, bp, b_fc, b2,
                       ln0g, ln0b, ln1g, ln1b, ln2g, ln2b,
                       fb1, fw2[:, 0], jnp.full((D,), fb2, F32)], axis=0)  # (16, D)
    w32 = jnp.concatenate([
        jnp.pad(word_emb, ((0, VOCAB_PAD - VOCAB), (0, 0))),   # (128, D)
        jnp.tile(pos_emb, (B, 1)),                             # (BS, D)
        wq, wk, wv, wo, wp,                                    # 5 x (D, D)
        w_fc, w2, fw1,                                         # (64,D) (64,D) (64,D)
        vec32], axis=0)
    assert w32.shape == (W32_ROWS, D)

    vec64 = jnp.concatenate([jnp.stack([b_bb, b1], axis=0),
                             jnp.zeros((14, FEAT), F32)], axis=0)          # (16, FEAT)
    w64 = jnp.concatenate([
        w_bb, jnp.zeros((16 - C_IMG, FEAT), F32),              # (16, FEAT)
        w1,                                                    # (D, FFN)
        vec64], axis=0)
    assert w64.shape == (W64_ROWS, FEAT)

    return {"w32": w32.astype(BF16), "w64": w64.astype(BF16)}


# ---------------------------------- forward -----------------------------------
@jax.jit
def hateful_memes_forward(params, images, input_ids, attention_mask):
    # tiny layout prep (flatten, pad image batch, fold masks) — glue only
    img = jnp.pad(images.reshape(B, IMG_FLAT),
                  ((0, B_PAD - B), (0, 0))).astype(BF16)                 # (8, 1024)
    ids_flat = input_ids.astype(jnp.int32).reshape(BS, 1)                # (16, 1)
    mask_flat = attention_mask.astype(F32).reshape(BS)                   # (16,)
    allowed = jnp.asarray(_SAME_NP) * mask_flat[None, :]
    attn_bias = (1.0 - allowed) * (-1e9)                                 # (16, 16)

    args = (ids_flat, attn_bias, img, params["w32"], params["w64"])
    out = pl.pallas_call(
        fused_kernel,
        out_shape=jax.ShapeDtypeStruct((B_PAD, OUT_LANES), F32),
        in_specs=[_VMEM] * len(args),
        out_specs=_VMEM,
    )(*args)
    return out[:B, :1]                                                   # (B, 1) logits


if __name__ == "__main__":
    key = jax.random.PRNGKey(0)
    k_img, k_ids, k_params = jax.random.split(key, 3)

    images = jax.random.normal(k_img, (B, C_IMG, HW, HW), F32)           # NCHW
    input_ids = jax.random.randint(k_ids, (B, S), 0, VOCAB, jnp.int32)
    attention_mask = jnp.array([[1, 1, 1, 1, 1, 1, 0, 0],
                                [1, 1, 1, 1, 0, 0, 0, 0]], jnp.int32)

    params = init_params(k_params)
    logits = hateful_memes_forward(params, images, input_ids, attention_mask)
    jax.block_until_ready(logits)
    assert logits.shape == (B, 1) and logits.dtype == jnp.float32
    assert bool(jnp.all(jnp.isfinite(logits)))
    print("KERNEL_OK")
</pallas_src>

<mosaic_0001>
module attributes {stable_mosaic.version = 11 : i64} {
  func.func @fused_kernel(%arg0: memref<16x1xi32, #tpu.memory_space<vmem>>, %arg1: memref<16x16xf32, #tpu.memory_space<vmem>>, %arg2: memref<8x1024xbf16, #tpu.memory_space<vmem>>, %arg3: memref<512x32xbf16, #tpu.memory_space<vmem>>, %arg4: memref<64x64xbf16, #tpu.memory_space<vmem>>, %arg5: memref<8x128xf32, #tpu.memory_space<vmem>>) attributes {dimension_semantics = [], scalar_prefetch = 0 : i64, scratch_operands = 0 : i64, tpu.core_type = #tpu.core_type<tc>} {
    %c496 = arith.constant 496 : index
    %c0 = arith.constant 0 : index
    %0 = vector.load %arg3[%c496, %c0] : memref<512x32xbf16, #tpu.memory_space<vmem>>, vector<16x32xbf16>
    %1 = arith.extf %0 : vector<16x32xbf16> to vector<16x32xf32>
    %c48 = arith.constant 48 : index
    %c0_0 = arith.constant 0 : index
    %2 = vector.load %arg4[%c48, %c0_0] : memref<64x64xbf16, #tpu.memory_space<vmem>>, vector<16x64xbf16>
    %3 = arith.extf %2 : vector<16x64xbf16> to vector<16x64xf32>
    %4 = vector.extract_strided_slice %1 {offsets = [0, 0], sizes = [1, 32], strides = [1, 1]} : vector<16x32xf32> to vector<1x32xf32>
    %5 = vector.extract_strided_slice %1 {offsets = [1, 0], sizes = [1, 32], strides = [1, 1]} : vector<16x32xf32> to vector<1x32xf32>
    %6 = vector.extract_strided_slice %1 {offsets = [2, 0], sizes = [1, 32], strides = [1, 1]} : vector<16x32xf32> to vector<1x32xf32>
    %7 = vector.extract_strided_slice %1 {offsets = [3, 0], sizes = [1, 32], strides = [1, 1]} : vector<16x32xf32> to vector<1x32xf32>
    %8 = vector.extract_strided_slice %1 {offsets = [4, 0], sizes = [1, 32], strides = [1, 1]} : vector<16x32xf32> to vector<1x32xf32>
    %9 = vector.extract_strided_slice %1 {offsets = [5, 0], sizes = [1, 32], strides = [1, 1]} : vector<16x32xf32> to vector<1x32xf32>
    %10 = vector.extract_strided_slice %1 {offsets = [6, 0], sizes = [1, 32], strides = [1, 1]} : vector<16x32xf32> to vector<1x32xf32>
    %11 = vector.extract_strided_slice %1 {offsets = [7, 0], sizes = [1, 32], strides = [1, 1]} : vector<16x32xf32> to vector<1x32xf32>
    %12 = vector.extract_strided_slice %1 {offsets = [8, 0], sizes = [1, 32], strides = [1, 1]} : vector<16x32xf32> to vector<1x32xf32>
    %13 = vector.extract_strided_slice %1 {offsets = [9, 0], sizes = [1, 32], strides = [1, 1]} : vector<16x32xf32> to vector<1x32xf32>
    %14 = vector.extract_strided_slice %1 {offsets = [10, 0], sizes = [1, 32], strides = [1, 1]} : vector<16x32xf32> to vector<1x32xf32>
    %15 = vector.extract_strided_slice %1 {offsets = [11, 0], sizes = [1, 32], strides = [1, 1]} : vector<16x32xf32> to vector<1x32xf32>
    %16 = vector.extract_strided_slice %1 {offsets = [12, 0], sizes = [1, 32], strides = [1, 1]} : vector<16x32xf32> to vector<1x32xf32>
    %17 = vector.extract_strided_slice %1 {offsets = [13, 0], sizes = [1, 32], strides = [1, 1]} : vector<16x32xf32> to vector<1x32xf32>
    %18 = vector.extract_strided_slice %1 {offsets = [14, 0], sizes = [1, 32], strides = [1, 1]} : vector<16x32xf32> to vector<1x32xf32>
    %19 = vector.extract_strided_slice %1 {offsets = [15, 0], sizes = [1, 1], strides = [1, 1]} : vector<16x32xf32> to vector<1x1xf32>
    %20 = vector.extract_strided_slice %3 {offsets = [0, 0], sizes = [1, 64], strides = [1, 1]} : vector<16x64xf32> to vector<1x64xf32>
    %21 = vector.extract_strided_slice %3 {offsets = [1, 0], sizes = [1, 64], strides = [1, 1]} : vector<16x64xf32> to vector<1x64xf32>
    %c0_1 = arith.constant 0 : index
    %c0_2 = arith.constant 0 : index
    %22 = vector.load %arg4[%c0_1, %c0_2] : memref<64x64xbf16, #tpu.memory_space<vmem>>, vector<16x64xbf16>
    %23 = arith.extf %22 : vector<16x64xbf16> to vector<16x64xf32>
    %c0_3 = arith.constant 0 : index
    %c0_4 = arith.constant 0 : index
    %24 = vector.load %arg2[%c0_3, %c0_4] : memref<8x1024xbf16, #tpu.memory_space<vmem>>, vector<8x1024xbf16>
    %25 = arith.extf %24 : vector<8x1024xbf16> to vector<8x1024xf32>
    %26 = vector.extract_strided_slice %25 {offsets = [0, 0], sizes = [8, 256], strides = [1, 1]} : vector<8x1024xf32> to vector<8x256xf32>
    %cst = arith.constant dense<0.000000e+00> : vector<8xf32>
    %27 = vector.multi_reduction <add>, %26, %cst [1] : vector<8x256xf32> to vector<8xf32>
    %28 = vector.shape_cast %27 : vector<8xf32> to vector<8x1xf32>
    %cst_5 = arith.constant 3.906250e-03 : f32
    %29 = vector.broadcast %cst_5 : f32 to vector<8x1xf32>
    %30 = arith.mulf %28, %29 : vector<8x1xf32>
    %31 = vector.extract_strided_slice %23 {offsets = [0, 0], sizes = [1, 64], strides = [1, 1]} : vector<16x64xf32> to vector<1x64xf32>
    %32 = vector.broadcast %30 : vector<8x1xf32> to vector<8x64xf32>
    %33 = vector.broadcast %31 : vector<1x64xf32> to vector<8x64xf32>
    %34 = arith.mulf %32, %33 : vector<8x64xf32>
    %35 = vector.broadcast %20 : vector<1x64xf32> to vector<8x64xf32>
    %36 = arith.addf %35, %34 : vector<8x64xf32>
    %37 = vector.extract_strided_slice %25 {offsets = [0, 256], sizes = [8, 256], strides = [1, 1]} : vector<8x1024xf32> to vector<8x256xf32>
    %cst_6 = arith.constant dense<0.000000e+00> : vector<8xf32>
    %38 = vector.multi_reduction <add>, %37, %cst_6 [1] : vector<8x256xf32> to vector<8xf32>
    %39 = vector.shape_cast %38 : vector<8xf32> to vector<8x1xf32>
    %cst_7 = arith.constant 3.906250e-03 : f32
    %40 = vector.broadcast %cst_7 : f32 to vector<8x1xf32>
    %41 = arith.mulf %39, %40 : vector<8x1xf32>
    %42 = vector.extract_strided_slice %23 {offsets = [1, 0], sizes = [1, 64], strides = [1, 1]} : vector<16x64xf32> to vector<1x64xf32>
    %43 = vector.broadcast %41 : vector<8x1xf32> to vector<8x64xf32>
    %44 = vector.broadcast %42 : vector<1x64xf32> to vector<8x64xf32>
    %45 = arith.mulf %43, %44 : vector<8x64xf32>
    %46 = arith.addf %36, %45 : vector<8x64xf32>
    %47 = vector.extract_strided_slice %25 {offsets = [0, 512], sizes = [8, 256], strides = [1, 1]} : vector<8x1024xf32> to vector<8x256xf32>
    %cst_8 = arith.constant dense<0.000000e+00> : vector<8xf32>
    %48 = vector.multi_reduction <add>, %47, %cst_8 [1] : vector<8x256xf32> to vector<8xf32>
    %49 = vector.shape_cast %48 : vector<8xf32> to vector<8x1xf32>
    %cst_9 = arith.constant 3.906250e-03 : f32
    %50 = vector.broadcast %cst_9 : f32 to vector<8x1xf32>
    %51 = arith.mulf %49, %50 : vector<8x1xf32>
    %52 = vector.extract_strided_slice %23 {offsets = [2, 0], sizes = [1, 64], strides = [1, 1]} : vector<16x64xf32> to vector<1x64xf32>
    %53 = vector.broadcast %51 : vector<8x1xf32> to vector<8x64xf32>
    %54 = vector.broadcast %52 : vector<1x64xf32> to vector<8x64xf32>
    %55 = arith.mulf %53, %54 : vector<8x64xf32>
    %56 = arith.addf %46, %55 : vector<8x64xf32>
    %57 = vector.extract_strided_slice %25 {offsets = [0, 768], sizes = [8, 256], strides = [1, 1]} : vector<8x1024xf32> to vector<8x256xf32>
    %cst_10 = arith.constant dense<0.000000e+00> : vector<8xf32>
    %58 = vector.multi_reduction <add>, %57, %cst_10 [1] : vector<8x256xf32> to vector<8xf32>
    %59 = vector.shape_cast %58 : vector<8xf32> to vector<8x1xf32>
    %cst_11 = arith.constant 3.906250e-03 : f32
    %60 = vector.broadcast %cst_11 : f32 to vector<8x1xf32>
    %61 = arith.mulf %59, %60 : vector<8x1xf32>
    %62 = vector.extract_strided_slice %23 {offsets = [3, 0], sizes = [1, 64], strides = [1, 1]} : vector<16x64xf32> to vector<1x64xf32>
    %63 = vector.broadcast %61 : vector<8x1xf32> to vector<8x64xf32>
    %64 = vector.broadcast %62 : vector<1x64xf32> to vector<8x64xf32>
    %65 = arith.mulf %63, %64 : vector<8x64xf32>
    %66 = arith.addf %56, %65 : vector<8x64xf32>
    %cst_12 = arith.constant 0.000000e+00 : f32
    %67 = vector.broadcast %cst_12 : f32 to vector<8x64xf32>
    %68 = arith.maximumf %66, %67 : vector<8x64xf32>
    %69 = arith.truncf %68 : vector<8x64xf32> to vector<8x64xbf16>
    %c304 = arith.constant 304 : index
    %c0_13 = arith.constant 0 : index
    %70 = vector.load %arg3[%c304, %c0_13] : memref<512x32xbf16, #tpu.memory_space<vmem>>, vector<64x32xbf16>
    %cst_14 = arith.constant dense<0.000000e+00> : vector<8x32xf32>
    %71 = tpu.matmul %69, %70, %cst_14 {dimension_numbers = #tpu.dot_dimension_numbers<[1], [0], [0], [1], [0, 0, 1, 1], [], []>} : vector<8x64xbf16>, vector<64x32xbf16>, vector<8x32xf32> -> vector<8x32xf32>
    %72 = vector.broadcast %9 : vector<1x32xf32> to vector<8x32xf32>
    %73 = arith.addf %71, %72 : vector<8x32xf32>
    %cst_15 = arith.constant 0.000000e+00 : f32
    %74 = vector.broadcast %cst_15 : f32 to vector<8x32xf32>
    %75 = arith.maximumf %73, %74 : vector<8x32xf32>
    %76 = arith.mulf %75, %75 : vector<8x32xf32>
    %cst_16 = arith.constant dense<0.000000e+00> : vector<8xf32>
    %77 = vector.multi_reduction <add>, %76, %cst_16 [1] : vector<8x32xf32> to vector<8xf32>
    %78 = vector.shape_cast %77 : vector<8xf32> to vector<8x1xf32>
    %cst_17 = arith.constant 1.000000e-24 : f32
    %79 = vector.broadcast %cst_17 : f32 to vector<8x1xf32>
    %80 = arith.maximumf %78, %79 : vector<8x1xf32>
    %81 = math.rsqrt %80 : vector<8x1xf32>
    %82 = vector.broadcast %81 : vector<8x1xf32> to vector<8x32xf32>
    %83 = arith.mulf %75, %82 : vector<8x32xf32>
    %c0_18 = arith.constant 0 : index
    %c0_19 = arith.constant 0 : index
    %84 = vector.load %arg0[%c0_18, %c0_19] : memref<16x1xi32, #tpu.memory_space<vmem>>, vector<16x1xi32>
    %85 = tpu.iota {dimensions = array<i32: 1>} : vector<16x128xi32>
    %86 = vector.broadcast %84 : vector<16x1xi32> to vector<16x128xi32>
    %87 = arith.cmpi eq, %86, %85 : vector<16x128xi32>
    %88 = arith.extui %87 : vector<16x128xi1> to vector<16x128xi32>
    %89 = arith.sitofp %88 : vector<16x128xi32> to vector<16x128xf32>
    %90 = arith.truncf %89 : vector<16x128xf32> to vector<16x128xbf16>
    %c0_20 = arith.constant 0 : index
    %c0_21 = arith.constant 0 : index
    %91 = vector.load %arg3[%c0_20, %c0_21] : memref<512x32xbf16, #tpu.memory_space<vmem>>, vector<128x32xbf16>
    %cst_22 = arith.constant dense<0.000000e+00> : vector<16x32xf32>
    %92 = tpu.matmul %90, %91, %cst_22 {dimension_numbers = #tpu.dot_dimension_numbers<[1], [0], [0], [1], [0, 0, 1, 1], [], []>} : vector<16x128xbf16>, vector<128x32xbf16>, vector<16x32xf32> -> vector<16x32xf32>
    %c128 = arith.constant 128 : index
    %c0_23 = arith.constant 0 : index
    %93 = vector.load %arg3[%c128, %c0_23] : memref<512x32xbf16, #tpu.memory_space<vmem>>, vector<16x32xbf16>
    %94 = arith.extf %93 : vector<16x32xbf16> to vector<16x32xf32>
    %95 = arith.addf %92, %94 : vector<16x32xf32>
    %cst_24 = arith.constant dense<0.000000e+00> : vector<16xf32>
    %96 = vector.multi_reduction <add>, %95, %cst_24 [1] : vector<16x32xf32> to vector<16xf32>
    %97 = vector.shape_cast %96 : vector<16xf32> to vector<16x1xf32>
    %cst_25 = arith.constant 3.200000e+01 : f32
    %98 = vector.broadcast %cst_25 : f32 to vector<16x1xf32>
    %99 = arith.divf %97, %98 : vector<16x1xf32>
    %100 = vector.broadcast %99 : vector<16x1xf32> to vector<16x32xf32>
    %101 = arith.subf %95, %100 : vector<16x32xf32>
    %102 = vector.broadcast %99 : vector<16x1xf32> to vector<16x32xf32>
    %103 = arith.subf %95, %102 : vector<16x32xf32>
    %104 = arith.mulf %101, %103 : vector<16x32xf32>
    %cst_26 = arith.constant dense<0.000000e+00> : vector<16xf32>
    %105 = vector.multi_reduction <add>, %104, %cst_26 [1] : vector<16x32xf32> to vector<16xf32>
    %106 = vector.shape_cast %105 : vector<16xf32> to vector<16x1xf32>
    %cst_27 = arith.constant 3.200000e+01 : f32
    %107 = vector.broadcast %cst_27 : f32 to vector<16x1xf32>
    %108 = arith.divf %106, %107 : vector<16x1xf32>
    %109 = vector.broadcast %99 : vector<16x1xf32> to vector<16x32xf32>
    %110 = arith.subf %95, %109 : vector<16x32xf32>
    %cst_28 = arith.constant 9.99999996E-13 : f32
    %111 = vector.broadcast %cst_28 : f32 to vector<16x1xf32>
    %112 = arith.addf %108, %111 : vector<16x1xf32>
    %113 = math.rsqrt %112 : vector<16x1xf32>
    %114 = vector.broadcast %113 : vector<16x1xf32> to vector<16x32xf32>
    %115 = arith.mulf %110, %114 : vector<16x32xf32>
    %116 = vector.broadcast %11 : vector<1x32xf32> to vector<16x32xf32>
    %117 = arith.mulf %115, %116 : vector<16x32xf32>
    %118 = vector.broadcast %12 : vector<1x32xf32> to vector<16x32xf32>
    %119 = arith.addf %117, %118 : vector<16x32xf32>
    %120 = arith.truncf %119 : vector<16x32xf32> to vector<16x32xbf16>
    %c144 = arith.constant 144 : index
    %c0_29 = arith.constant 0 : index
    %121 = vector.load %arg3[%c144, %c0_29] : memref<512x32xbf16, #tpu.memory_space<vmem>>, vector<32x32xbf16>
    %cst_30 = arith.constant dense<0.000000e+00> : vector<16x32xf32>
    %122 = tpu.matmul %120, %121, %cst_30 {dimension_numbers = #tpu.dot_dimension_numbers<[1], [0], [0], [1], [0, 0, 1, 1], [], []>} : vector<16x32xbf16>, vector<32x32xbf16>, vector<16x32xf32> -> vector<16x32xf32>
    %123 = vector.broadcast %4 : vector<1x32xf32> to vector<16x32xf32>
    %124 = arith.addf %122, %123 : vector<16x32xf32>
    %c176 = arith.constant 176 : index
    %c0_31 = arith.constant 0 : index
    %125 = vector.load %arg3[%c176, %c0_31] : memref<512x32xbf16, #tpu.memory_space<vmem>>, vector<32x32xbf16>
    %cst_32 = arith.constant dense<0.000000e+00> : vector<16x32xf32>
    %126 = tpu.matmul %120, %125, %cst_32 {dimension_numbers = #tpu.dot_dimension_numbers<[1], [0], [0], [1], [0, 0, 1, 1], [], []>} : vector<16x32xbf16>, vector<32x32xbf16>, vector<16x32xf32> -> vector<16x32xf32>
    %127 = vector.broadcast %5 : vector<1x32xf32> to vector<16x32xf32>
    %128 = arith.addf %126, %127 : vector<16x32xf32>
    %c208 = arith.constant 208 : index
    %c0_33 = arith.constant 0 : index
    %129 = vector.load %arg3[%c208, %c0_33] : memref<512x32xbf16, #tpu.memory_space<vmem>>, vector<32x32xbf16>
    %cst_34 = arith.constant dense<0.000000e+00> : vector<16x32xf32>
    %130 = tpu.matmul %120, %129, %cst_34 {dimension_numbers = #tpu.dot_dimension_numbers<[1], [0], [0], [1], [0, 0, 1, 1], [], []>} : vector<16x32xbf16>, vector<32x32xbf16>, vector<16x32xf32> -> vector<16x32xf32>
    %131 = vector.broadcast %6 : vector<1x32xf32> to vector<16x32xf32>
    %132 = arith.addf %130, %131 : vector<16x32xf32>
    %133 = arith.truncf %124 : vector<16x32xf32> to vector<16x32xbf16>
    %134 = arith.truncf %128 : vector<16x32xf32> to vector<16x32xbf16>
    %cst_35 = arith.constant dense<0.000000e+00> : vector<16x16xf32>
    %135 = tpu.matmul %133, %134, %cst_35 {dimension_numbers = #tpu.dot_dimension_numbers<[1], [1], [0], [0], [0, 0, 1, 0], [], []>} : vector<16x32xbf16>, vector<16x32xbf16>, vector<16x16xf32> -> vector<16x16xf32>
    %cst_36 = arith.constant 0.176776692 : f32
    %136 = vector.broadcast %cst_36 : f32 to vector<16x16xf32>
    %137 = arith.mulf %135, %136 : vector<16x16xf32>
    %c0_37 = arith.constant 0 : index
    %c0_38 = arith.constant 0 : index
    %138 = vector.load %arg1[%c0_37, %c0_38] : memref<16x16xf32, #tpu.memory_space<vmem>>, vector<16x16xf32>
    %139 = arith.addf %137, %138 : vector<16x16xf32>
    %cst_39 = arith.constant dense<0xFF800000> : vector<16xf32>
    %140 = vector.multi_reduction <maximumf>, %139, %cst_39 [1] : vector<16x16xf32> to vector<16xf32>
    %141 = vector.shape_cast %140 : vector<16xf32> to vector<16x1xf32>
    %142 = vector.broadcast %141 : vector<16x1xf32> to vector<16x16xf32>
    %143 = arith.subf %139, %142 : vector<16x16xf32>
    %144 = math.exp %143 : vector<16x16xf32>
    %cst_40 = arith.constant dense<0.000000e+00> : vector<16xf32>
    %145 = vector.multi_reduction <add>, %144, %cst_40 [1] : vector<16x16xf32> to vector<16xf32>
    %146 = vector.shape_cast %145 : vector<16xf32> to vector<16x1xf32>
    %147 = tpu.reciprocal %146 {approx = true} : vector<16x1xf32> -> vector<16x1xf32>
    %148 = vector.broadcast %147 : vector<16x1xf32> to vector<16x16xf32>
    %149 = arith.mulf %144, %148 : vector<16x16xf32>
    %150 = arith.truncf %149 : vector<16x16xf32> to vector<16x16xbf16>
    %151 = arith.truncf %132 : vector<16x32xf32> to vector<16x32xbf16>
    %cst_41 = arith.constant dense<0.000000e+00> : vector<16x32xf32>
    %152 = tpu.matmul %150, %151, %cst_41 {dimension_numbers = #tpu.dot_dimension_numbers<[1], [0], [0], [1], [0, 0, 1, 1], [], []>} : vector<16x16xbf16>, vector<16x32xbf16>, vector<16x32xf32> -> vector<16x32xf32>
    %153 = arith.truncf %152 : vector<16x32xf32> to vector<16x32xbf16>
    %c240 = arith.constant 240 : index
    %c0_42 = arith.constant 0 : index
    %154 = vector.load %arg3[%c240, %c0_42] : memref<512x32xbf16, #tpu.memory_space<vmem>>, vector<32x32xbf16>
    %cst_43 = arith.constant dense<0.000000e+00> : vector<16x32xf32>
    %155 = tpu.matmul %153, %154, %cst_43 {dimension_numbers = #tpu.dot_dimension_numbers<[1], [0], [0], [1], [0, 0, 1, 1], [], []>} : vector<16x32xbf16>, vector<32x32xbf16>, vector<16x32xf32> -> vector<16x32xf32>
    %156 = vector.broadcast %7 : vector<1x32xf32> to vector<16x32xf32>
    %157 = arith.addf %155, %156 : vector<16x32xf32>
    %158 = arith.addf %119, %157 : vector<16x32xf32>
    %cst_44 = arith.constant dense<0.000000e+00> : vector<16xf32>
    %159 = vector.multi_reduction <add>, %158, %cst_44 [1] : vector<16x32xf32> to vector<16xf32>
    %160 = vector.shape_cast %159 : vector<16xf32> to vector<16x1xf32>
    %cst_45 = arith.constant 3.200000e+01 : f32
    %161 = vector.broadcast %cst_45 : f32 to vector<16x1xf32>
    %162 = arith.divf %160, %161 : vector<16x1xf32>
    %163 = vector.broadcast %162 : vector<16x1xf32> to vector<16x32xf32>
    %164 = arith.subf %158, %163 : vector<16x32xf32>
    %165 = vector.broadcast %162 : vector<16x1xf32> to vector<16x32xf32>
    %166 = arith.subf %158, %165 : vector<16x32xf32>
    %167 = arith.mulf %164, %166 : vector<16x32xf32>
    %cst_46 = arith.constant dense<0.000000e+00> : vector<16xf32>
    %168 = vector.multi_reduction <add>, %167, %cst_46 [1] : vector<16x32xf32> to vector<16xf32>
    %169 = vector.shape_cast %168 : vector<16xf32> to vector<16x1xf32>
    %cst_47 = arith.constant 3.200000e+01 : f32
    %170 = vector.broadcast %cst_47 : f32 to vector<16x1xf32>
    %171 = arith.divf %169, %170 : vector<16x1xf32>
    %172 = vector.broadcast %162 : vector<16x1xf32> to vector<16x32xf32>
    %173 = arith.subf %158, %172 : vector<16x32xf32>
    %cst_48 = arith.constant 9.99999996E-13 : f32
    %174 = vector.broadcast %cst_48 : f32 to vector<16x1xf32>
    %175 = arith.addf %171, %174 : vector<16x1xf32>
    %176 = math.rsqrt %175 : vector<16x1xf32>
    %177 = vector.broadcast %176 : vector<16x1xf32> to vector<16x32xf32>
    %178 = arith.mulf %173, %177 : vector<16x32xf32>
    %179 = vector.broadcast %13 : vector<1x32xf32> to vector<16x32xf32>
    %180 = arith.mulf %178, %179 : vector<16x32xf32>
    %181 = vector.broadcast %14 : vector<1x32xf32> to vector<16x32xf32>
    %182 = arith.addf %180, %181 : vector<16x32xf32>
    %183 = arith.truncf %182 : vector<16x32xf32> to vector<16x32xbf16>
    %c16 = arith.constant 16 : index
    %c0_49 = arith.constant 0 : index
    %184 = vector.load %arg4[%c16, %c0_49] : memref<64x64xbf16, #tpu.memory_space<vmem>>, vector<32x64xbf16>
    %cst_50 = arith.constant dense<0.000000e+00> : vector<16x64xf32>
    %185 = tpu.matmul %183, %184, %cst_50 {dimension_numbers = #tpu.dot_dimension_numbers<[1], [0], [0], [1], [0, 0, 1, 1], [], []>} : vector<16x32xbf16>, vector<32x64xbf16>, vector<16x64xf32> -> vector<16x64xf32>
    %186 = vector.broadcast %21 : vector<1x64xf32> to vector<16x64xf32>
    %187 = arith.addf %185, %186 : vector<16x64xf32>
    %188 = arith.mulf %187, %187 : vector<16x64xf32>
    %189 = arith.mulf %187, %188 : vector<16x64xf32>
    %cst_51 = arith.constant 4.471500e-02 : f32
    %190 = vector.broadcast %cst_51 : f32 to vector<16x64xf32>
    %191 = arith.mulf %190, %189 : vector<16x64xf32>
    %192 = arith.addf %187, %191 : vector<16x64xf32>
    %cst_52 = arith.constant 0.797884583 : f32
    %193 = vector.broadcast %cst_52 : f32 to vector<16x64xf32>
    %194 = arith.mulf %193, %192 : vector<16x64xf32>
    %195 = math.tanh %194 : vector<16x64xf32>
    %cst_53 = arith.constant 1.000000e+00 : f32
    %196 = vector.broadcast %cst_53 : f32 to vector<16x64xf32>
    %197 = arith.addf %196, %195 : vector<16x64xf32>
    %cst_54 = arith.constant 5.000000e-01 : f32
    %198 = vector.broadcast %cst_54 : f32 to vector<16x64xf32>
    %199 = arith.mulf %198, %197 : vector<16x64xf32>
    %200 = arith.mulf %187, %199 : vector<16x64xf32>
    %201 = arith.truncf %200 : vector<16x64xf32> to vector<16x64xbf16>
    %c368 = arith.constant 368 : index
    %c0_55 = arith.constant 0 : index
    %202 = vector.load %arg3[%c368, %c0_55] : memref<512x32xbf16, #tpu.memory_space<vmem>>, vector<64x32xbf16>
    %cst_56 = arith.constant dense<0.000000e+00> : vector<16x32xf32>
    %203 = tpu.matmul %201, %202, %cst_56 {dimension_numbers = #tpu.dot_dimension_numbers<[1], [0], [0], [1], [0, 0, 1, 1], [], []>} : vector<16x64xbf16>, vector<64x32xbf16>, vector<16x32xf32> -> vector<16x32xf32>
    %204 = vector.broadcast %10 : vector<1x32xf32> to vector<16x32xf32>
    %205 = arith.addf %203, %204 : vector<16x32xf32>
    %206 = arith.addf %182, %205 : vector<16x32xf32>
    %cst_57 = arith.constant dense<0.000000e+00> : vector<16xf32>
    %207 = vector.multi_reduction <add>, %206, %cst_57 [1] : vector<16x32xf32> to vector<16xf32>
    %208 = vector.shape_cast %207 : vector<16xf32> to vector<16x1xf32>
    %cst_58 = arith.constant 3.200000e+01 : f32
    %209 = vector.broadcast %cst_58 : f32 to vector<16x1xf32>
    %210 = arith.divf %208, %209 : vector<16x1xf32>
    %211 = vector.broadcast %210 : vector<16x1xf32> to vector<16x32xf32>
    %212 = arith.subf %206, %211 : vector<16x32xf32>
    %213 = vector.broadcast %210 : vector<16x1xf32> to vector<16x32xf32>
    %214 = arith.subf %206, %213 : vector<16x32xf32>
    %215 = arith.mulf %212, %214 : vector<16x32xf32>
    %cst_59 = arith.constant dense<0.000000e+00> : vector<16xf32>
    %216 = vector.multi_reduction <add>, %215, %cst_59 [1] : vector<16x32xf32> to vector<16xf32>
    %217 = vector.shape_cast %216 : vector<16xf32> to vector<16x1xf32>
    %cst_60 = arith.constant 3.200000e+01 : f32
    %218 = vector.broadcast %cst_60 : f32 to vector<16x1xf32>
    %219 = arith.divf %217, %218 : vector<16x1xf32>
    %220 = vector.broadcast %210 : vector<16x1xf32> to vector<16x32xf32>
    %221 = arith.subf %206, %220 : vector<16x32xf32>
    %cst_61 = arith.constant 9.99999996E-13 : f32
    %222 = vector.broadcast %cst_61 : f32 to vector<16x1xf32>
    %223 = arith.addf %219, %222 : vector<16x1xf32>
    %224 = math.rsqrt %223 : vector<16x1xf32>
    %225 = vector.broadcast %224 : vector<16x1xf32> to vector<16x32xf32>
    %226 = arith.mulf %221, %225 : vector<16x32xf32>
    %227 = vector.broadcast %15 : vector<1x32xf32> to vector<16x32xf32>
    %228 = arith.mulf %226, %227 : vector<16x32xf32>
    %229 = vector.broadcast %16 : vector<1x32xf32> to vector<16x32xf32>
    %230 = arith.addf %228, %229 : vector<16x32xf32>
    %231 = tpu.iota {dimensions = array<i32: 0>} : vector<8x16xi32>
    %232 = tpu.iota {dimensions = array<i32: 1>} : vector<8x16xi32>
    %c8_i32 = arith.constant 8 : i32
    %233 = vector.broadcast %c8_i32 : i32 to vector<8x16xi32>
    %234 = arith.muli %231, %233 : vector<8x16xi32>
    %235 = arith.cmpi eq, %232, %234 : vector<8x16xi32>
    %236 = arith.extui %235 : vector<8x16xi1> to vector<8x16xi32>
    %237 = arith.sitofp %236 : vector<8x16xi32> to vector<8x16xf32>
    %cst_62 = arith.constant dense<0.000000e+00> : vector<8x32xf32>
    %238 = tpu.matmul %237, %230, %cst_62 {dimension_numbers = #tpu.dot_dimension_numbers<[1], [0], [0], [1], [0, 0, 1, 1], [], []>} : vector<8x16xf32>, vector<16x32xf32>, vector<8x32xf32> -> vector<8x32xf32>
    %239 = arith.truncf %238 : vector<8x32xf32> to vector<8x32xbf16>
    %c272 = arith.constant 272 : index
    %c0_63 = arith.constant 0 : index
    %240 = vector.load %arg3[%c272, %c0_63] : memref<512x32xbf16, #tpu.memory_space<vmem>>, vector<32x32xbf16>
    %cst_64 = arith.constant dense<0.000000e+00> : vector<8x32xf32>
    %241 = tpu.matmul %239, %240, %cst_64 {dimension_numbers = #tpu.dot_dimension_numbers<[1], [0], [0], [1], [0, 0, 1, 1], [], []>} : vector<8x32xbf16>, vector<32x32xbf16>, vector<8x32xf32> -> vector<8x32xf32>
    %242 = vector.broadcast %8 : vector<1x32xf32> to vector<8x32xf32>
    %243 = arith.addf %241, %242 : vector<8x32xf32>
    %244 = math.tanh %243 : vector<8x32xf32>
    %245 = arith.addf %238, %244 : vector<8x32xf32>
    %cst_65 = arith.constant 5.000000e-01 : f32
    %246 = vector.broadcast %cst_65 : f32 to vector<8x32xf32>
    %247 = arith.mulf %245, %246 : vector<8x32xf32>
    %248 = arith.mulf %247, %247 : vector<8x32xf32>
    %cst_66 = arith.constant dense<0.000000e+00> : vector<8xf32>
    %249 = vector.multi_reduction <add>, %248, %cst_66 [1] : vector<8x32xf32> to vector<8xf32>
    %250 = vector.shape_cast %249 : vector<8xf32> to vector<8x1xf32>
    %cst_67 = arith.constant 1.000000e-24 : f32
    %251 = vector.broadcast %cst_67 : f32 to vector<8x1xf32>
    %252 = arith.maximumf %250, %251 : vector<8x1xf32>
    %253 = math.rsqrt %252 : vector<8x1xf32>
    %254 = vector.broadcast %253 : vector<8x1xf32> to vector<8x32xf32>
    %255 = arith.mulf %247, %254 : vector<8x32xf32>
    %256 = arith.truncf %83 : vector<8x32xf32> to vector<8x32xbf16>
    %c432 = arith.constant 432 : index
    %c0_68 = arith.constant 0 : index
    %257 = vector.load %arg3[%c432, %c0_68] : memref<512x32xbf16, #tpu.memory_space<vmem>>, vector<32x32xbf16>
    %cst_69 = arith.constant dense<0.000000e+00> : vector<8x32xf32>
    %258 = tpu.matmul %256, %257, %cst_69 {dimension_numbers = #tpu.dot_dimension_numbers<[1], [0], [0], [1], [0, 0, 1, 1], [], []>} : vector<8x32xbf16>, vector<32x32xbf16>, vector<8x32xf32> -> vector<8x32xf32>
    %259 = arith.truncf %255 : vector<8x32xf32> to vector<8x32xbf16>
    %c464 = arith.constant 464 : index
    %c0_70 = arith.constant 0 : index
    %260 = vector.load %arg3[%c464, %c0_70] : memref<512x32xbf16, #tpu.memory_space<vmem>>, vector<32x32xbf16>
    %cst_71 = arith.constant dense<0.000000e+00> : vector<8x32xf32>
    %261 = tpu.matmul %259, %260, %cst_71 {dimension_numbers = #tpu.dot_dimension_numbers<[1], [0], [0], [1], [0, 0, 1, 1], [], []>} : vector<8x32xbf16>, vector<32x32xbf16>, vector<8x32xf32> -> vector<8x32xf32>
    %262 = arith.addf %258, %261 : vector<8x32xf32>
    %263 = vector.broadcast %17 : vector<1x32xf32> to vector<8x32xf32>
    %264 = arith.addf %262, %263 : vector<8x32xf32>
    %cst_72 = arith.constant 0.000000e+00 : f32
    %265 = vector.broadcast %cst_72 : f32 to vector<8x32xf32>
    %266 = arith.maximumf %264, %265 : vector<8x32xf32>
    %267 = vector.broadcast %18 : vector<1x32xf32> to vector<8x32xf32>
    %268 = arith.mulf %266, %267 : vector<8x32xf32>
    %cst_73 = arith.constant dense<0.000000e+00> : vector<8xf32>
    %269 = vector.multi_reduction <add>, %268, %cst_73 [1] : vector<8x32xf32> to vector<8xf32>
    %270 = vector.shape_cast %269 : vector<8xf32> to vector<8x1xf32>
    %271 = vector.broadcast %19 : vector<1x1xf32> to vector<8x1xf32>
    %272 = arith.addf %270, %271 : vector<8x1xf32>
    %273 = vector.shape_cast %272 : vector<8x1xf32> to vector<8x1xf32>
    %274 = vector.broadcast %273 : vector<8x1xf32> to vector<8x128xf32>
    %c0_74 = arith.constant 0 : index
    %c0_75 = arith.constant 0 : index
    %275 = vector.load %arg5[%c0_74, %c0_75] : memref<8x128xf32, #tpu.memory_space<vmem>>, vector<8x128xf32>
    tpu.vector_store %arg5[%c0_74, %c0_75], %274 {strides = array<i32>} : memref<8x128xf32, #tpu.memory_space<vmem>>, vector<8x128xf32>,
    return
  }
}

</mosaic_0001>

<bundles_post_ra>
// kernel: mul.8
= control target key start
LH: loop header
LB: loop body
LE: loop exit
PB: predicated region body
PF: predicated region fallthrough
CT: control target
= control target key end

     0   :  { %vm7_vm0 = vcmask 64512   ;;  %vm13_vm1 = vcmask 130112   ;;  %s39_s0 = inlined_call_operand.vmem [shape: f32[2,8], index: 0, kind: input, shape index: {}]   ;;  %s40_s1 = inlined_call_operand.vmem [shape: f32[16], index: 1, kind: output, shape index: {}]  }
   0x1   :  { %v4_v0 = vld [vmem:[%s39_s0] sm:$0x3]  ;;  %s22_s0 = smov 8  }
   0x2   :  { %5 = vst [vmem:[#allocation1] sm:$0x3] %v4_v0 }
   0x9   :  { %v10_v1 = vld [vmem:[#allocation1 + $0x1] sm:$0x1]   ;;  %v6_v2 = vld [vmem:[#allocation1] sm:$0x1]  }
   0xa   :  { %11 = vrot.lane.b32.xlu0 %v10_v1, %s22_s0  ;;  %8 = vst.msk [vmem:[#allocation0] sm:$0x1] %vm7_vm0, %v6_v2  }
  0x7c   :  { %v12_v3 = vpop.permute.xlu0 %11  }
  0x7d   :  { %14 = vst.msk [vmem:[#allocation0] sm:$0x1] %vm13_vm1, %v12_v3  }
  0x84   :  { %v18_v4 = vld [vmem:[#allocation0] sm:$0x1] }
  0x85   :  { %20 = vst [vmem:[%s40_s1] sm:$0x1] %v18_v4 }

// kernel: hateful_memes_forward.1
= control target key start
LH: loop header
LB: loop body
LE: loop exit
PB: predicated region body
PF: predicated region fallthrough
CT: control target
= control target key end

     0   :  { %v1571_v0 = vmov 0   ;;  %v1572_v2 = vmov 0.0   ;;  %vm1573_vm0 = vmmov 0   ;;  %v45_v12 = vlaneseq  ;;  %s1935_s0 = inlined_call_operand.vmem [shape: s32[16,1], index: 0, kind: input, shape index: {}]   ;;  %s1936_s3 = inlined_call_operand.vmem [shape: bf16[512,32], index: 3, kind: input, shape index: {}]   ;;  %s1937_s2 = inlined_call_operand.vmem [shape: bf16[8,1024], index: 2, kind: input, shape index: {}]   ;;  %s1938_s4 = inlined_call_operand.vmem [shape: bf16[64,64], index: 4, kind: input, shape index: {}]   ;;  %s1939_s1 = inlined_call_operand.vmem [shape: f32[16,16], index: 1, kind: input, shape index: {}]   ;;  %s1940_s5 = inlined_call_operand.vmem [shape: f32[8,128], index: 5, kind: output, shape index: {}]  }
   0x1   :  { %1508 = vset.pattern.permute.xlu0 %v1571_v0  ;;  %v176_v1 = vld [vmem:[%s1935_s0] sm:$0xff]  ;;  %1385 = vmatprep.subr.bf16.mxu1 %v1572_v2  ;;  %v177_v4 = vld [vmem:[%s1935_s0 + $0x8] sm:$0xff]  ;;  %v1511_v6 = vld [vmem:[%s1936_s3 + $0x10] sm:$0xff]   ;;  %v1574_v16 = vmov 1.0|1.0   ;;  %vm169_vm4 = vcmask 261120  }
   0x2   :  { %181 = vperm.xlu0 %1508, %v176_v1   ;;  %v1509_v3 = vld [vmem:[%s1936_s3] sm:$0xff]   ;;  %1373 = vmatprep.subr.bf16.mxu0 %v1572_v2  ;;  %v1510_v5 = vld [vmem:[%s1936_s3 + $0x8] sm:$0xff]   ;;  %v1512_v7 = vld [vmem:[%s1936_s3 + $0x18] sm:$0xff]   ;;  %v1651_v14 = vand.u32 127, %v45_v12  ;;  %v1701_v58 = vshrl.u32 %v45_v12, 7  ;;  %vm123_vm5 = vcmask 523264  }
   0x3   :  { %1386 = vmatpush3.bf16.msra.mxu1 %v1509_v3  ;;  %1401 = vmatprep.mubr.msk.bf16.mxu1 %vm1573_vm0, %v1572_v2  ;;  %v1513_v8 = vld [vmem:[%s1936_s3 + $0x20] sm:$0xff]   ;;  %v1514_v9 = vld [vmem:[%s1936_s3 + $0x28] sm:$0xff]   ;;  %v1515_v10 = vld [vmem:[%s1936_s3 + $0x30] sm:$0xff]   ;;  %vm583_vm6 = vcmask 130048  }
   0x4   :  { %1387 = vmatprep.subr.bf16.mxu1 %v1572_v2  ;;  %1381 = vmatprep.mubr.msk.bf16.mxu0 %vm1573_vm0, %v1572_v2  ;;  %v1516_v11 = vld [vmem:[%s1936_s3 + $0x38] sm:$0xff]   ;;  %v1322_v17 = vld [vmem:[%s1936_s3 + $0x40] sm:$0xff]   ;;  %v30_v31 = vld [vmem:[%s1937_s2 + $0x8] sm:$0xff]  ;;  %v1710_v62 = vsub.s32 0, %v1701_v58 }
   0x5   :  { %v1319_v18 = vunpack.c.l.bf16 %v1322_v17  ;;  %v1320_v19 = vunpack.c.h.bf16 %v1322_v17  ;;  %v29_v28 = vld [vmem:[%s1937_s2] sm:$0xff]  ;;  %v35_v33 = vunpack.c.l.bf16 %v30_v31  ;;  %v36_v34 = vunpack.c.h.bf16 %v30_v31  ;;  %v31_v42 = vld [vmem:[%s1937_s2 + $0x10] sm:$0xff]  ;;  %v32_v48 = vld [vmem:[%s1937_s2 + $0x18] sm:$0xff] }
   0x6   :  { %184 = vperm.xlu0 %1508, %v177_v4   ;;  %v33_v29 = vunpack.c.l.bf16 %v29_v28  ;;  %v34_v30 = vunpack.c.h.bf16 %v29_v28  ;;  %v37_v45 = vunpack.c.l.bf16 %v31_v42  ;;  %v38_v46 = vunpack.c.h.bf16 %v31_v42  ;;  %v1517_v54 = vld [vmem:[%s1936_s3 + $0x98] sm:$0xff]   ;;  %v1518_v55 = vld [vmem:[%s1936_s3 + $0xa0] sm:$0xff]   ;;  %v1519_v56 = vld [vmem:[%s1936_s3 + $0xa8] sm:$0xff]  }
   0x7   :  { %1388 = vmatpush3.bf16.msra.mxu1 %v1510_v5  ;;  %v55_v35 = vadd.f32 %v36_v34, %v35_v33  ;;  %v39_v51 = vunpack.c.l.bf16 %v32_v48  ;;  %v40_v52 = vunpack.c.h.bf16 %v32_v48  ;;  %1374 = vmatpush3.bf16.msra.mxu0 %v1517_v54  ;;  %v1520_v57 = vld [vmem:[%s1936_s3 + $0xb0] sm:$0xff]   ;;  %v1706_v59 = vld [vmem:[%s1938_s4] ss:$24 sps:$4 sm:$0xff]   ;;  %v1715_v5 = vsub.s32 1, %v1701_v58  ;;  %v1521_v42 = vld [vmem:[%s1936_s3 + $0x48] sm:$0xff]  }
   0x8   :  { %1389 = vmatprep.subr.bf16.mxu1 %v1572_v2  ;;  %v41_v32 = vadd.f32 %v34_v30, %v33_v29  ;;  %v65_v50 = vadd.f32 %v38_v46, %v37_v45  ;;  %1375 = vmatprep.subr.bf16.mxu0 %v1572_v2  ;;  %v28_v61 = vunpack.c.l.bf16 %v1706_v59  ;;  %v26_v0 = vunpack.c.h.bf16 %v1706_v59 }
   0x9   :  { %v75_v53 = vadd.f32 %v40_v52, %v39_v51  ;;  %v331_v30 = vsub.s32 7, %v1701_v58  ;;  %v1524_v51 = vld [vmem:[%s1936_s3 + $0x60] sm:$0xff]   ;;  %v1525_v52 = vld [vmem:[%s1936_s3 + $0x68] sm:$0xff]  }
   0xa   :  { %v48_v3 = vrot.slane %v28_v61, %v1710_v62  ;;  %v62_v12 = vrot.slane %v28_v61, %v1715_v5 }
   0xb   :  { %1390 = vmatpush3.bf16.msra.mxu1 %v1511_v6  ;;  %1376 = vmatpush3.bf16.msra.mxu0 %v1518_v55 }
   0xc   :  { %1391 = vmatprep.subr.bf16.mxu1 %v1572_v2  ;;  %1377 = vmatprep.subr.bf16.mxu0 %v1572_v2 }
   0xf   :  { %1392 = vmatpush3.bf16.msra.mxu1 %v1512_v7  ;;  %1378 = vmatpush3.bf16.msra.mxu0 %v1519_v56 }
  0x10   :  { %1393 = vmatprep.subr.bf16.mxu1 %v1572_v2  ;;  %1379 = vmatprep.subr.bf16.mxu0 %v1572_v2 }
  0x13   :  { %1394 = vmatpush3.bf16.msra.mxu1 %v1513_v8  ;;  %1380 = vmatpush3.bf16.msra.mxu0 %v1520_v57  ;;  %v1718_v8 = vsub.s32 2, %v1701_v58 }
  0x14   :  { %1395 = vmatprep.subr.bf16.mxu1 %v1572_v2  ;;  %1405 = vmatprep.subr.bf16.mxu0 %v1572_v2 }
  0x15   :  { %v72_v17 = vrot.slane %v28_v61, %v1718_v8 }
  0x17   :  { %1396 = vmatpush3.bf16.msra.mxu1 %v1514_v9  ;;  %v53_v9 = vrot.slane %v26_v0, %v1710_v62 }
  0x18   :  { %1397 = vmatprep.subr.bf16.mxu1 %v1572_v2 }
  0x1b   :  { %1398 = vmatpush3.bf16.msra.mxu1 %v1515_v10 }
  0x1c   :  { %1399 = vmatprep.subr.bf16.mxu1 %v1572_v2 }
  0x1f   :  { %1400 = vmatpush3.bf16.msra.mxu1 %v1516_v11 }
  0x20   :  { %1429 = vmatprep.subr.bf16.mxu1 %v1572_v2 }
  0x25   :  { %42 = vadd.xlane.f32.xlu0 %v41_v32 }
  0x81   :  { %v182_v13 = vpop.permute.xlu0 %181 }
  0x82   :  { %vm186_vm1 = vcmp.eq.s32.totalorder %v182_v13, %v1651_v14 }
  0x85   :  { %v185_v15 = vpop.permute.xlu0 %184 }
  0x86   :  { %vm187_vm2 = vcmp.eq.s32.totalorder %v185_v15, %v1651_v14 }
  0x87   :  { %vm1278_vm3 = vmpackc.low %vm187_vm2, %vm186_vm1 }
  0x88   :  { %1402 = vmatmul.mubr.msk.bf16.vlgmr.msra.gmra.mrb[0].mxu1 %vm1278_vm3, %v1574_v16 }
  0x89   :  { %1431 = vmatprep.mubr.msk.bf16.mxu1 %vm1573_vm0, %v1572_v2 }
  0xb2   :  { %v43_v63 = vpop.xlane.xlu0 %42 }
  0xb3   :  { %v44_v4 = vmul.f32 0.00390625, %v43_v63 }
  0xb5   :  { %v49_v11 = vmul.f32 %v48_v3, %v44_v4 }
 0x15b   :  { %v295_v20 = vpop.f32.mrb[0].mxu1 }
 0x15c   :  { %v296_v21 = vadd.f32 %v1319_v18, %v295_v20  ;;  %v1403_v22 = vpop.f32.mrb[1].mxu1  ;;  %v1726_v18 = vsub.s32 3, %v1701_v58  ;;  %v54_v20 = vadd.f32 %v53_v9, %v49_v11 }
 0x15d   :  { %v298_v23 = vpop.f32.mrb[2].mxu1 }
 0x15e   :  { %v299_v24 = vadd.f32 %v1320_v19, %v298_v23  ;;  %v1404_v25 = vpop.f32.mrb[3].mxu1  ;;  %v302_v26 = vsel %vm169_vm4, %v296_v21, 0.0 }
 0x15f   :  { %303 = vadd.xlane.f32.xlu1 %v302_v26  ;;  %v1321_v25 = vld [vmem:[%s1936_s3 + $0xf8] sm:$0xff]  }
 0x160   :  { %v305_v27 = vsel %vm169_vm4, %v299_v24, 0.0  ;;  %v1732_v29 = vunpack.c.l.bf16 %v1321_v25 }
 0x162   :  { %v413_v9 = vrot.slane %v1732_v29, %v1715_v5 }
 0x163   :  { %306 = vadd.xlane.f32.xlu1 %v305_v27 }
 0x167   :  { %56 = vadd.xlane.f32.xlu1 %v55_v35 }
 0x1ec   :  { %v304_v36 = vpop.xlane.xlu1 %303 }
 0x1ed   :  { %v309_v37 = vmul.f32 0.03125, %v304_v36  ;;  %v332_v36 = vrot.slane %v1732_v29, %v331_v30 }
 0x1ef   :  { %v1668_v38 = vsub.f32 %v296_v21, %v309_v37 }
 0x1f0   :  { %v307_v39 = vpop.xlane.xlu1 %306 }
 0x1f1   :  { %v310_v40 = vmul.f32 0.03125, %v307_v39  ;;  %v313_v41 = vmul.f32 %v1668_v38, %v1668_v38  ;;  %v1739_v39 = vunpack.c.h.bf16 %v1321_v25 }
 0x1f3   :  { %v1675_v43 = vsub.f32 %v299_v24, %v310_v40  ;;  %v315_v44 = vsel %vm169_vm4, %v313_v41, 0.0  ;;  %v82_v24 = vrot.slane %v28_v61, %v1726_v18 }
 0x1f4   :  { %316 = vadd.xlane.f32.xlu1 %v315_v44  ;;  %v57_v60 = vpop.xlane.xlu1 %56 }
 0x1f5   :  { %v314_v47 = vmul.f32 %v1675_v43, %v1675_v43  ;;  %v58_v13 = vmul.f32 0.00390625, %v57_v60  ;;  %v349_v60 = vrot.slane %v1732_v29, %v1710_v62 }
 0x1f7   :  { %v318_v49 = vsel %vm169_vm4, %v314_v47, 0.0  ;;  %v63_v21 = vmul.f32 %v62_v12, %v58_v13  ;;  %v338_v47 = vrot.slane %v1739_v39, %v1710_v62  ;;  %v474_v62 = vrot.slane %v1732_v29, %v1718_v8 }
 0x1f8   :  { %319 = vadd.xlane.f32.xlu1 %v318_v49  ;;  %v1523_v49 = vld [vmem:[%s1936_s3 + $0x58] sm:$0xff]  }
 0x1f9   :  { %v64_v27 = vadd.f32 %v63_v21, %v54_v20 }
 0x1fc   :  { %66 = vadd.xlane.f32.xlu1 %v65_v50 }
 0x200   :  { %76 = vadd.xlane.f32.xlu1 %v75_v53  ;;  %v1526_v53 = vld [vmem:[%s1936_s3 + $0x70] sm:$0xff]  }
 0x281   :  { %v317_v1 = vpop.xlane.xlu1 %316 }
 0x282   :  { %v321_v6 = vmul.f32 0.03125, %v317_v1 }
 0x284   :  { %v323_v7 = vadd.f32 1e-12, %v321_v6 }
 0x285   :  { %v320_v10 = vpop.xlane.xlu1 %319 }
 0x286   :  { %v322_v15 = vmul.f32 0.03125, %v320_v10  ;;  %1541 = vrsqrt.f32 %v323_v7 }
 0x288   :  { %v324_v16 = vadd.f32 1e-12, %v322_v15 }
 0x289   :  { %v67_v19 = vpop.xlane.xlu1 %66 }
 0x28a   :  { %1543 = vrsqrt.f32 %v324_v16  ;;  %v68_v22 = vmul.f32 0.00390625, %v67_v19 }
 0x28c   :  { %v73_v23 = vmul.f32 %v72_v17, %v68_v22 }
 0x28d   :  { %v77_v26 = vpop.xlane.xlu1 %76 }
 0x28e   :  { %v78_v28 = vmul.f32 0.00390625, %v77_v26  ;;  %v74_v31 = vadd.f32 %v73_v23, %v64_v27 }
 0x290   :  { %v83_v32 = vmul.f32 %v82_v24, %v78_v28  ;;  %v1542_v33 = vpop.eup %1541  ;;  %v579_v28 = vld [vmem:[%s1939_s1] sm:$0xff] }
 0x291   :  { %v327_v37 = vmul.f32 %v1542_v33, %v1668_v38  ;;  %v1522_v38 = vld [vmem:[%s1936_s3 + $0x50] sm:$0xff]  }
 0x292   :  { %v84_v34 = vadd.f32 %v83_v32, %v74_v31 }
 0x293   :  { %v333_v46 = vmul.f32 %v332_v36, %v327_v37 }
 0x294   :  { %v1544_v35 = vpop.eup %1543  ;;  %v85_v40 = vmax.f32 %v84_v34, 0.0  ;;  %v580_v34 = vld [vmem:[%s1939_s1 + $0x8] sm:$0xff] }
 0x295   :  { %v328_v41 = vmul.f32 %v1544_v35, %v1675_v43  ;;  %v1756_v48 = vadd.f32 %v338_v47, %v333_v46 }
 0x296   :  { %v86_v44 = vpack.c.bf16 %v85_v40, %v85_v40 }
 0x297   :  { %v334_v45 = vmul.f32 %v332_v36, %v328_v41 }
 0x298   :  { %1382 = vmatmul.mubr.msk.bf16.vlgmr.msra.gmra.mrb[0].mxu0 %vm123_vm5, %v86_v44 }
 0x299   :  { %1406 = vmatpush3.bf16.msra.mxu0 %v1521_v42  ;;  %1409 = vmatprep.mubr.msk.bf16.mxu0 %vm1573_vm0, %v1572_v2  ;;  %v1754_v43 = vadd.f32 %v338_v47, %v334_v45 }
 0x29a   :  { %1407 = vmatprep.subr.bf16.mxu0 %v1572_v2 }
 0x29b   :  { %v341_v50 = vpack.c.bf16 %v1754_v43, %v1756_v48 }
 0x29d   :  { %1408 = vmatpush3.bf16.msra.mxu0 %v1522_v38 }
 0x29e   :  { %1413 = vmatprep.subr.bf16.mxu0 %v1572_v2 }
 0x2a0   :  { %1410 = vmatmul.mubr.msk.bf16.vlgmr.msra.gmra.mrb[4].mxu0 %vm169_vm4, %v341_v50 }
 0x2a1   :  { %1414 = vmatpush3.bf16.msra.mxu0 %v1523_v49  ;;  %1417 = vmatprep.mubr.msk.bf16.mxu0 %vm1573_vm0, %v1572_v2 }
 0x2a2   :  { %1415 = vmatprep.subr.bf16.mxu0 %v1572_v2 }
 0x2a5   :  { %1416 = vmatpush3.bf16.msra.mxu0 %v1524_v51 }
 0x2a6   :  { %1421 = vmatprep.subr.bf16.mxu0 %v1572_v2 }
 0x2a8   :  { %1418 = vmatmul.mubr.msk.bf16.vlgmr.msra.gmra.mrb[8].mxu0 %vm169_vm4, %v341_v50 }
 0x2a9   :  { %1422 = vmatpush3.bf16.msra.mxu0 %v1525_v52  ;;  %1425 = vmatprep.mubr.msk.bf16.mxu0 %vm1573_vm0, %v1572_v2 }
 0x2aa   :  { %1423 = vmatprep.subr.bf16.mxu0 %v1572_v2 }
 0x2ad   :  { %1424 = vmatpush3.bf16.msra.mxu0 %v1526_v53 }
 0x2ae   :  { %1435 = vmatprep.subr.bf16.mxu0 %v1572_v2 }
 0x2b0   :  { %1426 = vmatmul.mubr.msk.bf16.vlgmr.msra.gmra.mrb[12].mxu0 %vm169_vm4, %v341_v50 }
 0x2b1   :  { %1437 = vmatprep.mubr.msk.bf16.mxu0 %vm1573_vm0, %v1572_v2 }
 0x36b   :  { %v1786_v54 = vpop.f32.mrb[0].mxu0 }
 0x36c   :  { %v1383_v55 = vpop.f32.mrb[1].mxu0 }
 0x36d   :  { %v164_v56 = vpop.f32.mrb[2].mxu0  ;;  %v1527_v55 = vld [vmem:[%s1936_s3 + $0x78] sm:$0xff]  }
 0x36e   :  { %v1384_v57 = vpop.f32.mrb[3].mxu0 }
 0x373   :  { %v399_v61 = vpop.f32.mrb[4].mxu0 }
 0x374   :  { %v1411_v63 = vpop.f32.mrb[5].mxu0  ;;  %v400_v3 = vadd.f32 %v399_v61, %v349_v60 }
 0x375   :  { %v402_v1 = vpop.f32.mrb[6].mxu0 }
 0x376   :  { %v403_v4 = vadd.f32 %v402_v1, %v349_v60  ;;  %v1412_v6 = vpop.f32.mrb[7].mxu0 }
 0x378   :  { %v528_v7 = vpack.c.bf16 %v403_v4, %v400_v3  ;;  %v1528_v4 = vld [vmem:[%s1936_s3 + $0x80] sm:$0xff]  }
 0x37b   :  { %v460_v10 = vpop.f32.mrb[8].mxu0 }
 0x37c   :  { %v1419_v11 = vpop.f32.mrb[9].mxu0  ;;  %v461_v13 = vadd.f32 %v460_v10, %v413_v9 }
 0x37d   :  { %v463_v12 = vpop.f32.mrb[10].mxu0 }
 0x37e   :  { %v464_v15 = vadd.f32 %v463_v12, %v413_v9  ;;  %v1420_v16 = vpop.f32.mrb[11].mxu0  ;;  %v660_v12 = vrot.slane %v1732_v29, %v1726_v18 }
 0x380   :  { %v529_v17 = vpack.c.bf16 %v464_v15, %v461_v13 }
 0x382   :  { %v534_v19 = vsel %vm169_vm4, %v529_v17, 0 }
 0x383   :  { %v521_v20 = vpop.f32.mrb[12].mxu0  ;;  %1430 = vmatpush3.bf16.xpose.msra.mxu1 %v534_v19 }
 0x384   :  { %v1427_v21 = vpop.f32.mrb[13].mxu0  ;;  %1441 = vmatprep.subr.bf16.mxu1 %v1572_v2  ;;  %v522_v23 = vadd.f32 %v521_v20, %v474_v62 }
 0x385   :  { %v524_v22 = vpop.f32.mrb[14].mxu0 }
 0x386   :  { %v525_v24 = vadd.f32 %v524_v22, %v474_v62  ;;  %v1428_v25 = vpop.f32.mrb[15].mxu0 }
 0x388   :  { %v607_v26 = vpack.c.bf16 %v525_v24, %v522_v23 }
 0x38a   :  { %1432 = vmatmul.mubr.msk.bf16.vlgmr.msra.gmra.mrb[4].mxu1 %vm169_vm4, %v528_v7  ;;  %1436 = vmatpush3.bf16.msra.mxu0 %v607_v26 }
 0x38b   :  { %1445 = vmatprep.mubr.msk.bf16.mxu1 %vm1573_vm0, %v1572_v2  ;;  %1449 = vmatprep.subr.bf16.mxu0 %v1572_v2 }
 0x38c   :  { %1442 = vmatpush3.bf16.msra.mxu1 %v1527_v55 }
 0x38d   :  { %1443 = vmatprep.subr.bf16.mxu1 %v1572_v2 }
 0x390   :  { %1444 = vmatpush3.bf16.msra.mxu1 %v1528_v4 }
 0x391   :  { %1457 = vmatprep.subr.bf16.mxu1 %v1572_v2 }
 0x45d   :  { %v570_v27 = vpop.f32.mrb[4].mxu1 }
 0x45e   :  { %v577_v31 = vmul.f32 0.17677669, %v570_v27  ;;  %v1433_v32 = vpop.f32.mrb[5].mxu1 }
 0x45f   :  { %v573_v33 = vpop.f32.mrb[6].mxu1 }
 0x460   :  { %v578_v35 = vmul.f32 0.17677669, %v573_v33  ;;  %v1434_v36 = vpop.f32.mrb[7].mxu1  ;;  %v581_v37 = vadd.f32 %v579_v28, %v577_v31 }
 0x462   :  { %v584_v40 = vsel %vm583_vm6, %v581_v37, -inf  ;;  %v582_v41 = vadd.f32 %v580_v34, %v578_v35  ;;  %v1530_v35 = vld [vmem:[%s1938_s4 + $0x10] sm:$0xff]  }
 0x463   :  { %585 = vmax.xlane.f32.xlu1 %v584_v40 }
 0x464   :  { %v587_v42 = vsel %vm583_vm6, %v582_v41, -inf }
 0x467   :  { %588 = vmax.xlane.f32.xlu1 %v587_v42 }
 0x4f0   :  { %v586_v44 = vpop.xlane.xlu1 %585 }
 0x4f1   :  { %v590_v45 = vsub.f32 %v581_v37, %v586_v44 }
 0x4f3   :  { %v592_v46 = vmul.f32 1.442695, %v590_v45  ;;  %v748_v45 = vrot.slane %v1739_v39, %v1715_v5 }
 0x4f4   :  { %v589_v47 = vpop.xlane.xlu1 %588 }
 0x4f5   :  { %1545 = vpow2.f32 %v592_v46  ;;  %v591_v38 = vsub.f32 %v582_v41, %v589_v47 }
 0x4f7   :  { %v594_v49 = vmul.f32 1.442695, %v591_v38 }
 0x4f9   :  { %1547 = vpow2.f32 %v594_v49  ;;  %v754_v49 = vrot.slane %v1739_v39, %v1718_v8  ;;  %v1532_v8 = vld [vmem:[%s1936_s3 + $0xc0] sm:$0xff]  }
 0x4ff   :  { %v1546_v50 = vpop.eup %1545 }
 0x500   :  { %v596_v51 = vsel %vm583_vm6, %v1546_v50, 0.0 }
 0x501   :  { %597 = vadd.xlane.f32.xlu1 %v596_v51 }
 0x503   :  { %v1548_v52 = vpop.eup %1547 }
 0x504   :  { %v599_v53 = vsel %vm583_vm6, %v1548_v52, 0.0 }
 0x505   :  { %600 = vadd.xlane.f32.xlu0 %v599_v53 }
 0x58e   :  { %v598_v56 = vpop.xlane.xlu1 %597 }
 0x58f   :  { %1549 = vrcp.f32 %v598_v56 }
 0x592   :  { %v601_v57 = vpop.xlane.xlu0 %600 }
 0x593   :  { %1551 = vrcp.f32 %v601_v57  ;;  %v1531_v57 = vld [vmem:[%s1936_s3 + $0xb8] sm:$0xff]  }
 0x599   :  { %v1550_v60 = vpop.eup %1549 }
 0x59a   :  { %v604_v63 = vmul.f32 %v1550_v60, %v1546_v50  ;;  %v1533_v60 = vld [vmem:[%s1936_s3 + $0xc8] sm:$0xff]  }
 0x59d   :  { %v1552_v61 = vpop.eup %1551 }
 0x59e   :  { %v605_v1 = vmul.f32 %v1552_v61, %v1548_v52  ;;  %v1534_v61 = vld [vmem:[%s1936_s3 + $0xd0] sm:$0xff]  }
 0x5a0   :  { %v606_v3 = vpack.c.bf16 %v605_v1, %v604_v63  ;;  %v765_v63 = vrot.slane %v26_v0, %v1715_v5 }
 0x5a2   :  { %1438 = vmatmul.mubr.msk.bf16.vlgmr.msra.gmra.mrb[16].mxu0 %vm583_vm6, %v606_v3 }
 0x5a3   :  { %1453 = vmatprep.mubr.msk.bf16.mxu0 %vm1573_vm0, %v1572_v2 }
 0x675   :  { %v645_v6 = vpop.f32.mrb[16].mxu0 }
 0x676   :  { %v1439_v7 = vpop.f32.mrb[17].mxu0 }
 0x677   :  { %v648_v9 = vpop.f32.mrb[18].mxu0 }
 0x678   :  { %v652_v10 = vpack.c.bf16 %v648_v9, %v645_v6  ;;  %v1440_v11 = vpop.f32.mrb[19].mxu0 }
 0x67a   :  { %1446 = vmatmul.mubr.msk.bf16.vlgmr.msra.gmra.mrb[8].mxu1 %vm169_vm4, %v652_v10 }
 0x67b   :  { %1465 = vmatprep.mubr.msk.bf16.mxu1 %vm1573_vm0, %v1572_v2  ;;  %1458 = vmatpush3.bf16.msra.mxu1 %v1531_v57 }
 0x67c   :  { %1459 = vmatprep.subr.bf16.mxu1 %v1572_v2 }
 0x67f   :  { %1460 = vmatpush3.bf16.msra.mxu1 %v1532_v8 }
 0x680   :  { %1461 = vmatprep.subr.bf16.mxu1 %v1572_v2 }
 0x683   :  { %1462 = vmatpush3.bf16.msra.mxu1 %v1533_v60 }
 0x684   :  { %1463 = vmatprep.subr.bf16.mxu1 %v1572_v2 }
 0x687   :  { %1464 = vmatpush3.bf16.msra.mxu1 %v1534_v61 }
 0x688   :  { %1484 = vmatprep.subr.bf16.mxu1 %v1572_v2 }
 0x74d   :  { %v710_v13 = vpop.f32.mrb[8].mxu1 }
 0x74e   :  { %v711_v15 = vadd.f32 %v710_v13, %v660_v12  ;;  %v1447_v16 = vpop.f32.mrb[9].mxu1 }
 0x74f   :  { %v713_v17 = vpop.f32.mrb[10].mxu1 }
 0x750   :  { %v714_v62 = vadd.f32 %v713_v17, %v660_v12  ;;  %v1448_v19 = vpop.f32.mrb[11].mxu1  ;;  %v717_v20 = vadd.f32 %v711_v15, %v1756_v48 }
 0x752   :  { %v719_v21 = vsel %vm169_vm4, %v717_v20, 0.0  ;;  %v718_v22 = vadd.f32 %v714_v62, %v1754_v43  ;;  %v1529_v43 = vld [vmem:[%s1938_s4 + $0x8] sm:$0xff]  }
 0x753   :  { %720 = vadd.xlane.f32.xlu1 %v719_v21  ;;  %1450 = vmatpush3.bf16.msra.mxu0 %v1529_v43 }
 0x754   :  { %v722_v23 = vsel %vm169_vm4, %v718_v22, 0.0  ;;  %1451 = vmatprep.subr.bf16.mxu0 %v1572_v2 }
 0x755   :  { %723 = vadd.xlane.f32.xlu0 %v722_v23 }
 0x757   :  { %1452 = vmatpush3.bf16.msra.mxu0 %v1530_v35 }
 0x7e0   :  { %v721_v24 = vpop.xlane.xlu1 %720 }
 0x7e1   :  { %v725_v25 = vmul.f32 0.03125, %v721_v24 }
 0x7e2   :  { %v724_v26 = vpop.xlane.xlu0 %723 }
 0x7e3   :  { %v727_v27 = vsub.f32 %v717_v20, %v725_v25  ;;  %v726_v28 = vmul.f32 0.03125, %v724_v26 }
 0x7e5   :  { %v728_v31 = vsub.f32 %v718_v22, %v726_v28  ;;  %v729_v32 = vmul.f32 %v727_v27, %v727_v27 }
 0x7e7   :  { %v731_v33 = vsel %vm169_vm4, %v729_v32, 0.0  ;;  %v730_v34 = vmul.f32 %v728_v31, %v728_v31 }
 0x7e8   :  { %732 = vadd.xlane.f32.xlu1 %v731_v33 }
 0x7e9   :  { %v734_v48 = vsel %vm169_vm4, %v730_v34, 0.0 }
 0x7ea   :  { %735 = vadd.xlane.f32.xlu0 %v734_v48 }
 0x875   :  { %v733_v36 = vpop.xlane.xlu1 %732 }
 0x876   :  { %v737_v37 = vmul.f32 0.03125, %v733_v36 }
 0x877   :  { %v736_v40 = vpop.xlane.xlu0 %735 }
 0x878   :  { %v739_v41 = vadd.f32 1e-12, %v737_v37  ;;  %v738_v42 = vmul.f32 0.03125, %v736_v40 }
 0x87a   :  { %1553 = vrsqrt.f32 %v739_v41  ;;  %v740_v44 = vadd.f32 1e-12, %v738_v42  ;;  %v97_v41 = vsub.s32 5, %v1701_v58 }
 0x87c   :  { %1555 = vrsqrt.f32 %v740_v44  ;;  %v98_v42 = vrot.slane %v1732_v29, %v97_v41 }
 0x87e   :  { %v162_v44 = vadd.f32 %v1786_v54, %v98_v42  ;;  %v1575_v54 = vmov 0.0|0.0  }
 0x87f   :  { %1500 = vmatprep.subr.bf16.mxu0 %v1575_v54 }
 0x884   :  { %v1554_v46 = vpop.eup %1553 }
 0x885   :  { %v743_v47 = vmul.f32 %v1554_v46, %v727_v27  ;;  %v851_v27 = vsub.s32 6, %v1701_v58 }
 0x886   :  { %v1556_v38 = vpop.eup %1555 }
 0x887   :  { %v749_v50 = vmul.f32 %v748_v45, %v743_v47  ;;  %v744_v51 = vmul.f32 %v1556_v38, %v728_v31  ;;  %v852_v28 = vrot.slane %v1732_v29, %v851_v27  ;;  %v167_v38 = vmax.f32 %v162_v44, 0.0 }
 0x889   :  { %v750_v52 = vmul.f32 %v748_v45, %v744_v51  ;;  %v755_v53 = vadd.f32 %v754_v49, %v749_v50 }
 0x88b   :  { %v756_v55 = vadd.f32 %v754_v49, %v750_v52 }
 0x88d   :  { %v757_v56 = vpack.c.bf16 %v756_v55, %v755_v53 }
 0x88f   :  { %1454 = vmatmul.mubr.msk.bf16.vlgmr.msra.gmra.mrb[20].mxu0 %vm169_vm4, %v757_v56  ;;  %v168_v56 = vmul.f32 %v167_v38, %v167_v38 }
 0x890   :  { %1473 = vmatprep.mubr.msk.f32.mxu0 %vm1573_vm0, %v1572_v2 }
 0x891   :  { %v170_v8 = vsel %vm169_vm4, %v168_v56, 0.0  ;;  %v1237_v56 = vrot.slane %v1739_v39, %v97_v41 }
 0x962   :  { %v815_v1 = vpop.f32.mrb[20].mxu0 }
 0x963   :  { %v816_v3 = vadd.f32 %v815_v1, %v765_v63  ;;  %v1455_v4 = vpop.f32.mrb[21].mxu0 }
 0x964   :  { %v818_v6 = vpop.f32.mrb[22].mxu0 }
 0x965   :  { %v822_v7 = vmul.f32 %v816_v3, %v816_v3  ;;  %v819_v9 = vadd.f32 %v818_v6, %v765_v63  ;;  %v1456_v10 = vpop.f32.mrb[23].mxu0  ;;  %v952_v6 = vrot.slane %v1739_v39, %v1726_v18 }
 0x967   :  { %v824_v11 = vmul.f32 %v822_v7, %v816_v3  ;;  %v823_v12 = vmul.f32 %v819_v9, %v819_v9  ;;  %v957_v7 = vsub.s32 4, %v1701_v58 }
 0x969   :  { %v826_v13 = vmul.f32 0.044715, %v824_v11  ;;  %v825_v15 = vmul.f32 %v823_v12, %v819_v9 }
 0x96b   :  { %v828_v16 = vadd.f32 %v826_v13, %v816_v3  ;;  %v827_v17 = vmul.f32 0.044715, %v825_v15  ;;  %v958_v15 = vrot.slane %v1739_v39, %v957_v7 }
 0x96d   :  { %v830_v62 = vmul.f32 0.7978846, %v828_v16  ;;  %v829_v19 = vadd.f32 %v827_v17, %v819_v9  ;;  %v963_v16 = vmul.u32 8, %v1701_v58 }
 0x96f   :  { %1557 = vtanh.f32 %v830_v62  ;;  %v831_v20 = vmul.f32 0.7978846, %v829_v19  ;;  %vm964_vm7 = vcmp.eq.s32.totalorder %v1651_v14, %v963_v16  ;;  %v1536_v14 = vld [vmem:[%s1936_s3 + $0x90] sm:$0xff]  }
 0x970   :  { %v1302_v18 = vsel %vm964_vm7, 1.0, %v1572_v2 }
 0x971   :  { %1559 = vtanh.f32 %v831_v20 }
 0x979   :  { %v1558_v59 = vpop.eup %1557 }
 0x97a   :  { %v834_v0 = vadd.f32 1.0, %v1558_v59  ;;  %v1535_v59 = vld [vmem:[%s1936_s3 + $0x88] sm:$0xff]  }
 0x97b   :  { %v1560_v5 = vpop.eup %1559 }
 0x97c   :  { %v836_v21 = vmul.f32 0.5, %v834_v0  ;;  %v835_v22 = vadd.f32 1.0, %v1560_v5 }
 0x97e   :  { %v837_v23 = vmul.f32 0.5, %v835_v22  ;;  %v838_v24 = vmul.f32 %v836_v21, %v816_v3  ;;  %v1537_v22 = vld [vmem:[%s1936_s3 + $0xd8] sm:$0xff]  }
 0x980   :  { %v839_v25 = vmul.f32 %v837_v23, %v819_v9 }
 0x982   :  { %v840_v26 = vpack.c.bf16 %v839_v25, %v838_v24 }
 0x984   :  { %1466 = vmatmul.mubr.msk.bf16.vlgmr.msra.gmra.mrb[12].mxu1 %vm123_vm5, %v840_v26  ;;  %v1538_v26 = vld [vmem:[%s1936_s3 + $0xe0] sm:$0xff]  }
 0x985   :  { %1488 = vmatprep.mubr.msk.bf16.mxu1 %vm1573_vm0, %v1572_v2 }
 0xa57   :  { %v914_v31 = vpop.f32.mrb[12].mxu1 }
 0xa58   :  { %v915_v32 = vadd.f32 %v914_v31, %v852_v28  ;;  %v1467_v33 = vpop.f32.mrb[13].mxu1 }
 0xa59   :  { %v917_v34 = vpop.f32.mrb[14].mxu1 }
 0xa5a   :  { %v918_v48 = vadd.f32 %v917_v34, %v852_v28  ;;  %v1468_v43 = vpop.f32.mrb[15].mxu1  ;;  %v921_v35 = vadd.f32 %v915_v32, %v755_v53  ;;  %v1048_v32 = vrot.slane %v1732_v29, %v957_v7  ;;  %v1539_v29 = vld [vmem:[%s1936_s3 + $0xe8] sm:$0xff]  }
 0xa5b   :  { %1485 = vmatpush3.bf16.msra.mxu1 %v1539_v29 }
 0xa5c   :  { %v923_v36 = vsel %vm169_vm4, %v921_v35, 0.0  ;;  %v922_v37 = vadd.f32 %v918_v48, %v756_v55  ;;  %1486 = vmatprep.subr.bf16.mxu1 %v1572_v2 }
 0xa5d   :  { %924 = vadd.xlane.f32.xlu1 %v923_v36 }
 0xa5e   :  { %v926_v40 = vsel %vm169_vm4, %v922_v37, 0.0 }
 0xa5f   :  { %927 = vadd.xlane.f32.xlu0 %v926_v40 }
 0xaea   :  { %v925_v45 = vpop.xlane.xlu1 %924 }
 0xaeb   :  { %v929_v46 = vmul.f32 0.03125, %v925_v45 }
 0xaec   :  { %v928_v47 = vpop.xlane.xlu0 %927 }
 0xaed   :  { %v931_v49 = vsub.f32 %v921_v35, %v929_v46  ;;  %v930_v50 = vmul.f32 0.03125, %v928_v47 }
 0xaef   :  { %v932_v51 = vsub.f32 %v922_v37, %v930_v50  ;;  %v933_v52 = vmul.f32 %v931_v49, %v931_v49 }
 0xaf1   :  { %v935_v53 = vsel %vm169_vm4, %v933_v52, 0.0  ;;  %v934_v55 = vmul.f32 %v932_v51, %v932_v51 }
 0xaf2   :  { %936 = vadd.xlane.f32.xlu1 %v935_v53 }
 0xaf3   :  { %v938_v57 = vsel %vm169_vm4, %v934_v55, 0.0 }
 0xaf4   :  { %939 = vadd.xlane.f32.xlu0 %v938_v57 }
 0xaf6   :  { %171 = vadd.xlane.f32.xlu1 %v170_v8 }
 0xb7f   :  { %v937_v60 = vpop.xlane.xlu1 %936 }
 0xb80   :  { %v941_v61 = vmul.f32 0.03125, %v937_v60 }
 0xb81   :  { %v940_v63 = vpop.xlane.xlu0 %939 }
 0xb82   :  { %v943_v1 = vadd.f32 1e-12, %v941_v61  ;;  %v942_v3 = vmul.f32 0.03125, %v940_v63  ;;  %v1243_v63 = vrot.slane %v1739_v39, %v851_v27 }
 0xb83   :  { %v172_v0 = vpop.xlane.xlu1 %171 }
 0xb84   :  { %1561 = vrsqrt.f32 %v943_v1  ;;  %v944_v4 = vadd.f32 1e-12, %v942_v3  ;;  %v173_v5 = vmax.f32 %v172_v0, 1e-24 }
 0xb86   :  { %1563 = vrsqrt.f32 %v944_v4 }
 0xb87   :  { %1565 = vrsqrt.f32 %v173_v5 }
 0xb8e   :  { %v1562_v9 = vpop.eup %1561 }
 0xb8f   :  { %v947_v10 = vmul.f32 %v1562_v9, %v931_v49  ;;  %v1540_v49 = vld [vmem:[%s1936_s3 + $0xf0] sm:$0xff]  }
 0xb90   :  { %v1564_v11 = vpop.eup %1563  ;;  %1487 = vmatpush3.bf16.msra.mxu1 %v1540_v49 }
 0xb91   :  { %v948_v12 = vmul.f32 %v1564_v11, %v932_v51  ;;  %v953_v13 = vmul.f32 %v952_v6, %v947_v10  ;;  %v1566_v25 = vpop.eup %1565 }
 0xb92   :  { %v175_v28 = vmul.f32 %v1566_v25, %v167_v38 }
 0xb93   :  { %v954_v17 = vmul.f32 %v952_v6, %v948_v12  ;;  %v959_v62 = vadd.f32 %v958_v15, %v953_v13  ;;  %v1251_v6 = vrot.slane %v1739_v39, %v331_v30 }
 0xb94   :  { %v1114_v31 = vpack.c.bf16 %v175_v28, %v175_v28 }
 0xb95   :  { %v960_v19 = vadd.f32 %v958_v15, %v954_v17 }
 0xb97   :  { %v1501_v20 = vpack.c.bf16 %v960_v19, %v959_v62 }
 0xb99   :  { %1502 = vmatpush3.bf16.msra.mxu0 %v1501_v20 }
 0xb9a   :  { %1476 = vmatprep.subr.bf16.mxu0 %v1572_v2 }
 0xb9c   :  { %1474 = vmatmul.mubr.msk.f32.vlgmr.msra.gmra.mrb[24].mxu0 %vm583_vm6, %v1302_v18 }
 0xb9d   :  { %1477 = vmatpush3.bf16.msra.mxu0 %v1535_v59  ;;  %1480 = vmatprep.mubr.msk.bf16.mxu0 %vm1573_vm0, %v1572_v2 }
 0xb9e   :  { %1478 = vmatprep.subr.bf16.mxu0 %v1572_v2 }
 0xba1   :  { %1479 = vmatpush3.bf16.msra.mxu0 %v1536_v14 }
 0xba2   :  { %1492 = vmatprep.subr.bf16.mxu0 %v1572_v2 }
 0xc6f   :  { %v1036_v21 = vpop.f32.mrb[24].mxu0 }
 0xc70   :  { %v1040_v23 = vpack.c.bf16 %v1036_v21, %v1036_v21  ;;  %v1475_v24 = vpop.f32.mrb[25].mxu0 }
 0xc72   :  { %1481 = vmatmul.mubr.msk.bf16.vlgmr.msra.gmra.mrb[28].mxu0 %vm169_vm4, %v1040_v23 }
 0xc73   :  { %1493 = vmatpush3.bf16.msra.mxu0 %v1537_v22  ;;  %1496 = vmatprep.mubr.msk.bf16.mxu0 %vm1573_vm0, %v1572_v2 }
 0xc74   :  { %1494 = vmatprep.subr.bf16.mxu0 %v1572_v2 }
 0xc77   :  { %1495 = vmatpush3.bf16.msra.mxu0 %v1538_v26 }
 0xc7a   :  { %1497 = vmatmul.mubr.msk.bf16.vlgmr.msra.gmra.mrb[32].mxu0 %vm169_vm4, %v1114_v31 }
 0xd45   :  { %v1098_v33 = vpop.f32.mrb[28].mxu0 }
 0xd46   :  { %v1099_v34 = vadd.f32 %v1098_v33, %v1048_v32  ;;  %v1482_v48 = vpop.f32.mrb[29].mxu0 }
 0xd47   :  { %v1101_v43 = vpop.f32.mrb[30].mxu0 }
 0xd48   :  { %1567 = vtanh.f32 %v1099_v34  ;;  %v1483_v35 = vpop.f32.mrb[31].mxu0 }
 0xd4d   :  { %v1228_v36 = vpop.f32.mrb[32].mxu0 }
 0xd4e   :  { %v1498_v37 = vpop.f32.mrb[33].mxu0 }
 0xd4f   :  { %v1231_v40 = vpop.f32.mrb[34].mxu0 }
 0xd50   :  { %v1499_v42 = vpop.f32.mrb[35].mxu0 }
 0xd52   :  { %v1568_v44 = vpop.eup %1567 }
 0xd53   :  { %v1105_v45 = vadd.f32 %v1568_v44, %v1036_v21 }
 0xd55   :  { %v1106_v46 = vmul.f32 0.5, %v1105_v45 }
 0xd57   :  { %v1107_v47 = vmul.f32 %v1106_v46, %v1106_v46 }
 0xd59   :  { %v1108_v38 = vsel %vm169_vm4, %v1107_v47, 0.0 }
 0xd5a   :  { %1109 = vadd.xlane.f32.xlu0 %v1108_v38 }
 0xde7   :  { %v1110_v50 = vpop.xlane.xlu0 %1109 }
 0xde8   :  { %v1111_v51 = vmax.f32 %v1110_v50, 1e-24 }
 0xdea   :  { %1569 = vrsqrt.f32 %v1111_v51 }
 0xdf4   :  { %v1570_v52 = vpop.eup %1569 }
 0xdf5   :  { %v1113_v53 = vmul.f32 %v1570_v52, %v1106_v46 }
 0xdf7   :  { %v1119_v55 = vpack.c.bf16 %v1113_v53, %v1113_v53 }
 0xdf9   :  { %1489 = vmatmul.mubr.msk.bf16.vlgmr.msra.gmra.mrb[16].mxu1 %vm169_vm4, %v1119_v55 }
 0xecc   :  { %v1173_v57 = vpop.f32.mrb[16].mxu1 }
 0xecd   :  { %v1229_v8 = vadd.f32 %v1228_v36, %v1173_v57  ;;  %v1490_v2 = vpop.f32.mrb[17].mxu1 }
 0xece   :  { %v1176_v54 = vpop.f32.mrb[18].mxu1 }
 0xecf   :  { %v1238_v60 = vadd.f32 %v1237_v56, %v1229_v8  ;;  %v1491_v61 = vpop.f32.mrb[19].mxu1 }
 0xed1   :  { %v1239_v1 = vmax.f32 %v1238_v60, 0.0 }
 0xed3   :  { %v1244_v3 = vmul.f32 %v1243_v63, %v1239_v1 }
 0xed5   :  { %v1245_v4 = vsel %vm169_vm4, %v1244_v3, 0.0 }
 0xed6   :  { %1246 = vadd.xlane.f32.xlu1 %v1245_v4 }
 0xf63   :  { %v1247_v41 = vpop.xlane.xlu1 %1246 }
 0xf64   :  { %v1252_v7 = vadd.f32 %v1251_v6, %v1247_v41 }
 0xf66   :  { %1255 = vperm.xlu0 %1508, %v1252_v7  }
 0xfe5   :  { %v1256_v9 = vpop.permute.xlu0 %1255 }
 0xfe6   :  { %1258 = vst [vmem:[%s1940_s5] sm:$0xff] %v1256_v9 }

</bundles_post_ra>
